<compile_context>
chip_gen: v7x
topology: tpu7x:2x2x1
jax: 0.10.0
libtpu: 0.0.40
codegen_flags: <defaults>
</compile_context>

<pallas_src>
import functools

import jax
import jax.numpy as jnp
from jax import lax
from jax.experimental import pallas as pl
from jax.experimental.pallas import tpu as pltpu


# ---------------------------------------------------------------------------
# Main path: each sample's M elements viewed as (S, 128); grid = (N, S-blocks)
# ---------------------------------------------------------------------------
def _dice_partials_kernel(x_ref, t_ref, o_ref, acc_ref, *,
                          s_tile, s_total, chunk, nchunks, ragged):
    """Per-sample partial sums [sum(p*t), sum(p), sum(t)].

    x_ref, t_ref : (1, s_tile, 128) tiles of one sample (caller dtype).
    o_ref        : (1, 3, 128) f32 output block, written on the last j step.
    acc_ref      : (3, 8, 128) f32 VMEM scratch, resident across the j axis.
    """
    j = pl.program_id(1)
    nj = pl.num_programs(1)

    @pl.when(j == 0)
    def _():
        acc_ref[...] = jnp.zeros_like(acc_ref)

    def accumulate(mask_rows):
        # Strip-mined single pass: one (chunk, 128) slab of x and t at a time,
        # sigmoid computed once, folded straight into three (8, 128) vreg-
        # sized accumulators.  No full-tile f32 intermediates.
        def body(c, carry):
            a_pt, a_p, a_t = carry
            r0 = pl.multiple_of(c * chunk, 8)
            xs = x_ref[0, pl.ds(r0, chunk), :].astype(jnp.float32)
            ts = t_ref[0, pl.ds(r0, chunk), :].astype(jnp.float32)
            # Single-EUP-op sigmoid: sigmoid(x) = 0.5 * (tanh(x/2) + 1).
            p = 0.5 * (jnp.tanh(0.5 * xs) + 1.0)
            if mask_rows:
                # Only the last j block can be partial; garbage rows from the
                # partial-block read are zeroed with where (blocks NaN/Inf).
                rows_left = (s_total - j * s_tile) - c * chunk
                row = lax.broadcasted_iota(jnp.int32, (chunk, 128), 0)
                valid = row < rows_left
                p = jnp.where(valid, p, 0.0)
                ts = jnp.where(valid, ts, 0.0)

            def fold(v):  # (chunk, 128) -> (8, 128): pure VPU vreg adds
                return jnp.sum(v.reshape(chunk // 8, 8, 128), axis=0)

            return (a_pt + fold(p * ts), a_p + fold(p), a_t + fold(ts))

        zeros = (jnp.zeros((8, 128), jnp.float32),) * 3
        return lax.fori_loop(0, nchunks, body, zeros)

    if ragged:
        # Steady-state j steps run fully unmasked; the iota/compare/select
        # only executes on the final (partial) block.
        a_pt, a_p, a_t = lax.cond(j == nj - 1,
                                  lambda: accumulate(True),
                                  lambda: accumulate(False))
    else:
        a_pt, a_p, a_t = accumulate(False)

    acc_ref[0] += a_pt
    acc_ref[1] += a_p
    acc_ref[2] += a_t

    @pl.when(j == nj - 1)
    def _():
        # One sublane (XLU) reduce per sample, off the steady-state path;
        # writes a lane-dense (3, 128) block instead of (3, 8, 128) to HBM.
        o_ref[0] = jnp.sum(acc_ref[...], axis=1)


def _dice_partials(x, t, *, max_block_bytes):
    n, m = x.shape
    s_total = m // 128
    x3 = x.reshape(n, s_total, 128)           # contiguous reshape: no copy
    t3 = t.reshape(n, s_total, 128)

    bytes_per_row = 128 * (x.dtype.itemsize + t.dtype.itemsize)
    rows_cap = max(8, (max_block_bytes // bytes_per_row) // 8 * 8)
    s_aligned = (s_total // 8) * 8            # >= 8 because m >= 1024

    chunk = min(256, rows_cap, s_aligned)     # rows per in-kernel strip (x8)
    s_tile = max(chunk, (min(rows_cap, s_aligned) // chunk) * chunk)
    nchunks = s_tile // chunk
    nj = pl.cdiv(s_total, s_tile)
    ragged = (s_total % s_tile) != 0

    kernel = functools.partial(_dice_partials_kernel, s_tile=s_tile,
                               s_total=s_total, chunk=chunk, nchunks=nchunks,
                               ragged=ragged)

    # Footprint-aware VMEM budget: double-buffered input blocks + f32 strip
    # intermediates + accumulator/output blocks + compiler headroom.  Clamp to
    # <= 48 MiB so it is safe on v7x (64 MiB) while overriding v5e's 16 MiB
    # scoped default.
    in_block_bytes = s_tile * 128 * (x.dtype.itemsize + t.dtype.itemsize)
    f32_strip_bytes = 6 * chunk * 128 * 4
    need = (2 * in_block_bytes + f32_strip_bytes
            + 3 * 8 * 128 * 4 + 2 * 3 * 128 * 4 + (2 << 20))
    vmem_limit = int(min(48 << 20, max(32 << 20, need)))

    out = pl.pallas_call(
        kernel,
        out_shape=jax.ShapeDtypeStruct((n, 3, 128), jnp.float32),
        grid=(n, nj),
        in_specs=[
            pl.BlockSpec((1, s_tile, 128), lambda i, j: (i, j, 0)),
            pl.BlockSpec((1, s_tile, 128), lambda i, j: (i, j, 0)),
        ],
        out_specs=pl.BlockSpec((1, 3, 128), lambda i, j: (i, 0, 0)),
        scratch_shapes=[pltpu.VMEM((3, 8, 128), jnp.float32)],
        compiler_params=pltpu.CompilerParams(
            dimension_semantics=("parallel", "arbitrary"),
            vmem_limit_bytes=vmem_limit),
    )(x3, t3)

    # Tiny final cross-lane reduction (n x 1.5 KiB) outside the kernel loop.
    return out.sum(axis=-1)                   # (n, 3)


# ---------------------------------------------------------------------------
# Fallback path: small or lane-unaligned M; all samples batched per grid step.
# ---------------------------------------------------------------------------
def _dice_sums_2d_kernel(x_ref, t_ref, o_ref, *, m, tile, ragged):
    k = pl.program_id(0)
    nk = pl.num_programs(0)

    @pl.when(k == 0)
    def _():
        o_ref[...] = jnp.zeros_like(o_ref)

    x = x_ref[...].astype(jnp.float32)        # (n, tile)
    t = t_ref[...].astype(jnp.float32)
    p = 0.5 * (jnp.tanh(0.5 * x) + 1.0)       # single-EUP-op sigmoid

    if ragged:
        def mask(args):
            p_, t_ = args
            col = lax.broadcasted_iota(jnp.int32, p_.shape, 1)
            valid = col < (m - k * tile)
            return jnp.where(valid, p_, 0.0), jnp.where(valid, t_, 0.0)
        # Lane mask only on the final (partial) block.
        p, t = lax.cond(k == nk - 1, mask, lambda a: a, (p, t))

    o_ref[...] += jnp.stack(
        [jnp.sum(p * t, axis=1), jnp.sum(p, axis=1), jnp.sum(t, axis=1)],
        axis=-1)


def _dice_sums_2d(x, t, *, max_block_bytes):
    n, m = x.shape
    if m <= 128:
        tile = m                              # block equals the full dims
    else:
        per_col = n * (x.dtype.itemsize + t.dtype.itemsize)
        target = max(128, max_block_bytes // max(1, per_col))
        tile = min((m // 128) * 128, (target // 128) * 128)
        tile = max(tile, 128)
    nk = pl.cdiv(m, tile)
    ragged = (m % tile) != 0

    kernel = functools.partial(_dice_sums_2d_kernel, m=m, tile=tile,
                               ragged=ragged)

    in_block_bytes = n * tile * (x.dtype.itemsize + t.dtype.itemsize)
    need = 2 * in_block_bytes + 6 * n * tile * 4 + (2 << 20)
    vmem_limit = int(min(48 << 20, max(32 << 20, need)))

    # TODO(synk): tile the batch axis as well for very large N with tiny M;
    # this fallback keeps all N samples resident in one block per grid step.
    out = pl.pallas_call(
        kernel,
        out_shape=jax.ShapeDtypeStruct((n, 3), jnp.float32),
        grid=(nk,),
        in_specs=[
            pl.BlockSpec((n, tile), lambda k: (0, k)),
            pl.BlockSpec((n, tile), lambda k: (0, k)),
        ],
        out_specs=pl.BlockSpec((n, 3), lambda k: (0, 0)),
        compiler_params=pltpu.CompilerParams(
            dimension_semantics=("arbitrary",),
            vmem_limit_bytes=vmem_limit),
    )(x, t)
    return out                                # (n, 3)


# ---------------------------------------------------------------------------
# Public wrapper (matches BinarySorensenDiceLossFunction.forward semantics).
# ---------------------------------------------------------------------------
def binary_sorensen_dice_loss(inputs, targets, epsilon: float = 1.0,
                              max_block_bytes: int = 4 * 1024 * 1024):
    # torch.atleast_2d semantics: 1-D input becomes a single sample.
    if inputs.ndim < 2:
        inputs = inputs.reshape(1, -1)
        targets = targets.reshape(1, -1)

    n = inputs.shape[0]
    x = inputs.reshape(n, -1)                 # keep caller dtype (bf16 ok)
    t = targets.reshape(n, -1)
    m = x.shape[1]

    elem_bytes = x.dtype.itemsize + t.dtype.itemsize
    use_main = (m % 128 == 0) and (m >= 1024)
    if use_main and n > 64 and m * elem_bytes < (256 << 10):
        # Many small samples: batching them in the 2-D path keeps per-step
        # DMAs large, provided a 128-lane column strip of the batch fits.
        if n * 128 * elem_bytes <= max_block_bytes:
            use_main = False

    if use_main:
        sums = _dice_partials(x, t, max_block_bytes=max_block_bytes)
    else:
        sums = _dice_sums_2d(x, t, max_block_bytes=max_block_bytes)

    inter = sums[:, 0]
    sum_p = sums[:, 1]
    sum_t = sums[:, 2]
    dice = (2.0 * inter + epsilon) / (sum_p + sum_t + epsilon)
    return 1.0 - jnp.mean(dice)


def _reference(inputs, targets, epsilon=1.0):
    if inputs.ndim < 2:
        inputs = inputs.reshape(1, -1)
        targets = targets.reshape(1, -1)
    n = inputs.shape[0]
    p = jax.nn.sigmoid(inputs.astype(jnp.float32)).reshape(n, -1)
    t = targets.astype(jnp.float32).reshape(n, -1)
    dice = (2.0 * jnp.sum(p * t, axis=1) + epsilon) / (
        jnp.sum(p, axis=1) + jnp.sum(t, axis=1) + epsilon)
    return 1.0 - jnp.mean(dice)


if __name__ == "__main__":
    key = jax.random.PRNGKey(0)
    ks = jax.random.split(key, 8)

    # 1) (N, C, H, W) logits / probabilities -> main (S, 128) path, no ragged.
    x = jax.random.normal(ks[0], (2, 4, 16, 16), dtype=jnp.float32)
    tg = jax.random.uniform(ks[1], (2, 4, 16, 16), dtype=jnp.float32)
    loss = jax.jit(functools.partial(binary_sorensen_dice_loss,
                                     epsilon=1.0))(x, tg)
    loss = jax.block_until_ready(loss)
    ref = _reference(x, tg, epsilon=1.0)
    assert jnp.allclose(loss, ref, rtol=1e-5, atol=1e-5), (loss, ref)

    # 2) Lane-unaligned M -> fallback path, mask only on the final block.
    x2 = jax.random.normal(ks[2], (2, 5, 7, 9), dtype=jnp.float32)
    tg2 = jax.random.uniform(ks[3], (2, 5, 7, 9), dtype=jnp.float32)
    loss2 = jax.block_until_ready(
        jax.jit(functools.partial(binary_sorensen_dice_loss,
                                  epsilon=1.0))(x2, tg2))
    ref2 = _reference(x2, tg2, epsilon=1.0)
    assert jnp.allclose(loss2, ref2, rtol=1e-5, atol=1e-5), (loss2, ref2)

    # 3) Main path with a ragged last S-block (small block size forces it).
    x3 = jax.random.normal(ks[4], (3, 40, 128), dtype=jnp.float32)
    tg3 = jax.random.uniform(ks[5], (3, 40, 128), dtype=jnp.float32)
    loss3 = jax.block_until_ready(
        jax.jit(functools.partial(binary_sorensen_dice_loss, epsilon=1.0,
                                  max_block_bytes=16 * 1024))(x3, tg3))
    ref3 = _reference(x3, tg3, epsilon=1.0)
    assert jnp.allclose(loss3, ref3, rtol=1e-5, atol=1e-5), (loss3, ref3)

    # 4) Tiny M (< 128) -> single-step fallback with a full-dims block.
    x4 = jax.random.normal(ks[6], (2, 60), dtype=jnp.float32)
    tg4 = jax.random.uniform(ks[7], (2, 60), dtype=jnp.float32)
    loss4 = jax.block_until_ready(
        jax.jit(functools.partial(binary_sorensen_dice_loss,
                                  epsilon=1.0))(x4, tg4))
    ref4 = _reference(x4, tg4, epsilon=1.0)
    assert jnp.allclose(loss4, ref4, rtol=1e-5, atol=1e-5), (loss4, ref4)

    print("KERNEL_OK")
</pallas_src>

<mosaic_0001>
module attributes {stable_mosaic.version = 11 : i64} {
  func.func @_dice_partials_kernel(%arg0: i32, %arg1: i32, %arg2: memref<1x8x128xf32, #tpu.memory_space<vmem>>, %arg3: memref<1x8x128xf32, #tpu.memory_space<vmem>>, %arg4: memref<1x3x128xf32, #tpu.memory_space<vmem>>, %arg5: memref<3x8x128xf32, #tpu.memory_space<vmem>>) attributes {dimension_semantics = [#tpu.dimension_semantics<parallel>, #tpu.dimension_semantics<arbitrary>], iteration_bounds = array<i64: 2, 1>, scalar_prefetch = 0 : i64, scratch_operands = 1 : i64, tpu.core_type = #tpu.core_type<tc>, window_params = [{transform_indices = @transform_0, window_bounds = array<i64: 1, 8, 128>}, {transform_indices = @transform_1, window_bounds = array<i64: 1, 8, 128>}, {transform_indices = @transform_2, window_bounds = array<i64: 1, 3, 128>}]} {
    %c0_i32 = arith.constant 0 : i32
    %0 = arith.cmpi eq, %arg1, %c0_i32 : i32
    %1 = arith.extui %0 : i1 to i32
    %c0_i32_0 = arith.constant 0 : i32
    %2 = arith.cmpi ne, %1, %c0_i32_0 : i32
    scf.if %2 {
      %cst_29 = arith.constant 0.000000e+00 : f32
      %50 = vector.broadcast %cst_29 : f32 to vector<3x8x128xf32>
      %c0_30 = arith.constant 0 : index
      %c0_31 = arith.constant 0 : index
      %c0_32 = arith.constant 0 : index
      %51 = vector.load %arg5[%c0_30, %c0_31, %c0_32] : memref<3x8x128xf32, #tpu.memory_space<vmem>>, vector<3x8x128xf32>
      tpu.vector_store %arg5[%c0_30, %c0_31, %c0_32], %50 {strides = array<i32>} : memref<3x8x128xf32, #tpu.memory_space<vmem>>, vector<3x8x128xf32>,
    } else {
    }
    %cst = arith.constant 0.000000e+00 : f32
    %3 = vector.broadcast %cst : f32 to vector<8x128xf32>
    %c0_i32_1 = arith.constant 0 : i32
    %c8_i32 = arith.constant 8 : i32
    %4 = arith.muli %c0_i32_1, %c8_i32 : i32
    %5 = tpu.assume_multiple %4, 8 : i32
    %c0 = arith.constant 0 : index
    %6 = arith.index_cast %5 : i32 to index
    %c0_2 = arith.constant 0 : index
    %7 = vector.load %arg2[%c0, %6, %c0_2] : memref<1x8x128xf32, #tpu.memory_space<vmem>>, vector<1x8x128xf32>
    %8 = vector.shape_cast %7 : vector<1x8x128xf32> to vector<8x128xf32>
    %c0_3 = arith.constant 0 : index
    %9 = arith.index_cast %5 : i32 to index
    %c0_4 = arith.constant 0 : index
    %10 = vector.load %arg3[%c0_3, %9, %c0_4] : memref<1x8x128xf32, #tpu.memory_space<vmem>>, vector<1x8x128xf32>
    %11 = vector.shape_cast %10 : vector<1x8x128xf32> to vector<8x128xf32>
    %cst_5 = arith.constant 5.000000e-01 : f32
    %12 = vector.broadcast %cst_5 : f32 to vector<8x128xf32>
    %13 = arith.mulf %12, %8 : vector<8x128xf32>
    %14 = math.tanh %13 : vector<8x128xf32>
    %cst_6 = arith.constant 1.000000e+00 : f32
    %15 = vector.broadcast %cst_6 : f32 to vector<8x128xf32>
    %16 = arith.addf %14, %15 : vector<8x128xf32>
    %cst_7 = arith.constant 5.000000e-01 : f32
    %17 = vector.broadcast %cst_7 : f32 to vector<8x128xf32>
    %18 = arith.mulf %17, %16 : vector<8x128xf32>
    %19 = arith.mulf %18, %11 : vector<8x128xf32>
    %20 = vector.shape_cast %19 : vector<8x128xf32> to vector<1x8x128xf32>
    %cst_8 = arith.constant dense<0.000000e+00> : vector<8x128xf32>
    %21 = vector.multi_reduction <add>, %20, %cst_8 [0] : vector<1x8x128xf32> to vector<8x128xf32>
    %22 = arith.addf %3, %21 : vector<8x128xf32>
    %23 = vector.shape_cast %18 : vector<8x128xf32> to vector<1x8x128xf32>
    %cst_9 = arith.constant dense<0.000000e+00> : vector<8x128xf32>
    %24 = vector.multi_reduction <add>, %23, %cst_9 [0] : vector<1x8x128xf32> to vector<8x128xf32>
    %25 = arith.addf %3, %24 : vector<8x128xf32>
    %26 = vector.shape_cast %11 : vector<8x128xf32> to vector<1x8x128xf32>
    %cst_10 = arith.constant dense<0.000000e+00> : vector<8x128xf32>
    %27 = vector.multi_reduction <add>, %26, %cst_10 [0] : vector<1x8x128xf32> to vector<8x128xf32>
    %28 = arith.addf %3, %27 : vector<8x128xf32>
    %c1_i32 = arith.constant 1 : i32
    %c0_11 = arith.constant 0 : index
    %c0_12 = arith.constant 0 : index
    %c0_13 = arith.constant 0 : index
    %29 = vector.load %arg5[%c0_11, %c0_12, %c0_13] : memref<3x8x128xf32, #tpu.memory_space<vmem>>, vector<1x8x128xf32>
    %30 = vector.shape_cast %29 : vector<1x8x128xf32> to vector<8x128xf32>
    %31 = arith.addf %30, %22 : vector<8x128xf32>
    %c0_14 = arith.constant 0 : index
    %c0_15 = arith.constant 0 : index
    %c0_16 = arith.constant 0 : index
    %32 = vector.load %arg5[%c0_14, %c0_15, %c0_16] : memref<3x8x128xf32, #tpu.memory_space<vmem>>, vector<1x8x128xf32>
    %33 = vector.shape_cast %32 : vector<1x8x128xf32> to vector<8x128xf32>
    %34 = vector.shape_cast %31 : vector<8x128xf32> to vector<1x8x128xf32>
    tpu.vector_store %arg5[%c0_14, %c0_15, %c0_16], %34 {strides = array<i32>} : memref<3x8x128xf32, #tpu.memory_space<vmem>>, vector<1x8x128xf32>,
    %c1 = arith.constant 1 : index
    %c0_17 = arith.constant 0 : index
    %c0_18 = arith.constant 0 : index
    %35 = vector.load %arg5[%c1, %c0_17, %c0_18] : memref<3x8x128xf32, #tpu.memory_space<vmem>>, vector<1x8x128xf32>
    %36 = vector.shape_cast %35 : vector<1x8x128xf32> to vector<8x128xf32>
    %37 = arith.addf %36, %25 : vector<8x128xf32>
    %c1_19 = arith.constant 1 : index
    %c0_20 = arith.constant 0 : index
    %c0_21 = arith.constant 0 : index
    %38 = vector.load %arg5[%c1_19, %c0_20, %c0_21] : memref<3x8x128xf32, #tpu.memory_space<vmem>>, vector<1x8x128xf32>
    %39 = vector.shape_cast %38 : vector<1x8x128xf32> to vector<8x128xf32>
    %40 = vector.shape_cast %37 : vector<8x128xf32> to vector<1x8x128xf32>
    tpu.vector_store %arg5[%c1_19, %c0_20, %c0_21], %40 {strides = array<i32>} : memref<3x8x128xf32, #tpu.memory_space<vmem>>, vector<1x8x128xf32>,
    %c2 = arith.constant 2 : index
    %c0_22 = arith.constant 0 : index
    %c0_23 = arith.constant 0 : index
    %41 = vector.load %arg5[%c2, %c0_22, %c0_23] : memref<3x8x128xf32, #tpu.memory_space<vmem>>, vector<1x8x128xf32>
    %42 = vector.shape_cast %41 : vector<1x8x128xf32> to vector<8x128xf32>
    %43 = arith.addf %42, %28 : vector<8x128xf32>
    %c2_24 = arith.constant 2 : index
    %c0_25 = arith.constant 0 : index
    %c0_26 = arith.constant 0 : index
    %44 = vector.load %arg5[%c2_24, %c0_25, %c0_26] : memref<3x8x128xf32, #tpu.memory_space<vmem>>, vector<1x8x128xf32>
    %45 = vector.shape_cast %44 : vector<1x8x128xf32> to vector<8x128xf32>
    %46 = vector.shape_cast %43 : vector<8x128xf32> to vector<1x8x128xf32>
    tpu.vector_store %arg5[%c2_24, %c0_25, %c0_26], %46 {strides = array<i32>} : memref<3x8x128xf32, #tpu.memory_space<vmem>>, vector<1x8x128xf32>,
    %c0_i32_27 = arith.constant 0 : i32
    %47 = arith.cmpi eq, %arg1, %c0_i32_27 : i32
    %48 = arith.extui %47 : i1 to i32
    %c0_i32_28 = arith.constant 0 : i32
    %49 = arith.cmpi ne, %48, %c0_i32_28 : i32
    scf.if %49 {
      %c0_29 = arith.constant 0 : index
      %c0_30 = arith.constant 0 : index
      %c0_31 = arith.constant 0 : index
      %50 = vector.load %arg5[%c0_29, %c0_30, %c0_31] : memref<3x8x128xf32, #tpu.memory_space<vmem>>, vector<3x8x128xf32>
      %cst_32 = arith.constant dense<0.000000e+00> : vector<3x128xf32>
      %51 = vector.multi_reduction <add>, %50, %cst_32 [1] : vector<3x8x128xf32> to vector<3x128xf32>
      %c0_33 = arith.constant 0 : index
      %c0_34 = arith.constant 0 : index
      %c0_35 = arith.constant 0 : index
      %52 = vector.load %arg4[%c0_33, %c0_34, %c0_35] : memref<1x3x128xf32, #tpu.memory_space<vmem>>, vector<1x3x128xf32>
      %53 = vector.shape_cast %52 : vector<1x3x128xf32> to vector<3x128xf32>
      %54 = vector.shape_cast %51 : vector<3x128xf32> to vector<1x3x128xf32>
      tpu.vector_store %arg4[%c0_33, %c0_34, %c0_35], %54 {strides = array<i32>} : memref<1x3x128xf32, #tpu.memory_space<vmem>>, vector<1x3x128xf32>,
    } else {
    }
    return
  }
  func.func @transform_0(%arg0: i32, %arg1: i32) -> (i32, i32, i32) {
    %c0_i32 = arith.constant 0 : i32
    %c0_i32_0 = arith.constant 0 : i32
    return %arg0, %arg1, %c0_i32 : i32, i32, i32
  }
  func.func @transform_1(%arg0: i32, %arg1: i32) -> (i32, i32, i32) {
    %c0_i32 = arith.constant 0 : i32
    %c0_i32_0 = arith.constant 0 : i32
    return %arg0, %arg1, %c0_i32 : i32, i32, i32
  }
  func.func @transform_2(%arg0: i32, %arg1: i32) -> (i32, i32, i32) {
    %c0_i32 = arith.constant 0 : i32
    %c0_i32_0 = arith.constant 0 : i32
    %c0_i32_1 = arith.constant 0 : i32
    return %arg0, %c0_i32, %c0_i32_0 : i32, i32, i32
  }
}

</mosaic_0001>

<bundles_post_ra>
// kernel: binary_sorensen_dice_loss.1
= control target key start
LH: loop header
LB: loop body
LE: loop exit
PB: predicated region body
PF: predicated region fallthrough
CT: control target
= control target key end

     0   :  { %s408_s9 = smov 0   ;;  %s410_s10 = smov 0   ;;  %s448_s0 = inlined_call_operand.vmem [shape: f32[2,8,128], index: 0, kind: input, shape index: {}]   ;;  %s449_s1 = inlined_call_operand.vmem [shape: f32[2,8,128], index: 1, kind: input, shape index: {}]   ;;  %s450_s2 = inlined_call_operand.vmem [shape: f32[2,3,128], index: 2, kind: output, shape index: {}]  }
   0x1   :  { %s412_s11 = smov 0  }
   0x2 LB: > { %s24_s12 = sadd.s32 1, %s387_s10  ;;  %p337_p0 = scmp.ge.s32.totalorder %s391_s11, 1  ;;  %s391_s11 = sphi %s412_s11, %s12_s11   ;;  %s387_s10 = sphi %s410_s10, %s452_s10   ;;  %s383_s9 = sphi %s408_s9, %s451_s9  }
   0x3   : > { %p26_p1 = scmp.ge.s32.totalorder %s24_s12, 2  ;;  %p142_p2 = scmp.lt.s32.totalorder %s391_s11, 3 }
   0x5   : > { %s454_s12 = smov (%p26_p1, %s24_s12), 0  ;;  %p143_p3 = pnand %p337_p0, %p142_p2 }
   0x6   : > { %p172_p4 = scmp.lt.s32.totalorder (!%p143_p3), %s383_s9, 1  ;;  %vm248_vm0 = vcmask (!%p143_p3), 1041409   ;;  %vm250_vm1 = vcmask (!%p143_p3), 1042434  }
   0x7   : > { %146 = sbr.rel (%p143_p3) target bundleno = 52 (0x34), region = 28 }
   0xe   : > { %s456_s9 = smov (!%p172_p4, %s383_s9), 1 }
   0xf   : > { %s338_s13 = sshll.u32 %s456_s9, 3  ;;  %s340_s20 = sshll.u32 %s456_s9, 2 }
  0x10   : > { %s178_s16 = scalar_lea.vmem %s448_s0, %s338_s13  ;;  %s185_s19 = scalar_lea.vmem %s449_s1, %s338_s13 }
  0x11   : > { %v197_v0 = vld [vmem:[%s178_s16] sm:$0xff]  ;;  %s189_s23 = scalar_lea.vmem %s450_s2, %s340_s20 }
  0x12   : > { %v199_v1 = vmul.f32 0.5, %v197_v0  ;;  %v198_v2 = vld [vmem:[%s185_s19] sm:$0xff] }
  0x13   : > { %v239_v3 = vrot.slane %v198_v2, 4 }
  0x14   : > { %367 = vtanh.f32 %v199_v1 }
  0x15   : > { %v240_v5 = vadd.f32 %v239_v3, %v198_v2 }
  0x17   : > { %v241_v8 = vrot.slane %v240_v5, 2 }
  0x19   : > { %v242_v13 = vadd.f32 %v241_v8, %v240_v5 }
  0x1b   : > { %v243_v18 = vrot.slane %v242_v13, 1 }
  0x1d   : > { %v244_v23 = vadd.f32 %v243_v18, %v242_v13 }
  0x1e   : > { %v368_v4 = vpop.eup %367 }
  0x1f   : > { %v201_v6 = vadd.f32 1.0, %v368_v4 }
  0x21   : > { %v202_v7 = vmul.f32 0.5, %v201_v6 }
  0x23   : > { %v203_v9 = vmul.f32 %v202_v7, %v198_v2  ;;  %v233_v10 = vrot.slane %v202_v7, 4 }
  0x25   : > { %v227_v11 = vrot.slane %v203_v9, 4  ;;  %v234_v12 = vadd.f32 %v233_v10, %v202_v7 }
  0x27   : > { %v228_v14 = vadd.f32 %v227_v11, %v203_v9  ;;  %v235_v15 = vrot.slane %v234_v12, 2 }
  0x29   : > { %v229_v16 = vrot.slane %v228_v14, 2  ;;  %v236_v17 = vadd.f32 %v235_v15, %v234_v12 }
  0x2b   : > { %v230_v19 = vadd.f32 %v229_v16, %v228_v14  ;;  %v237_v20 = vrot.slane %v236_v17, 1 }
  0x2d   : > { %v231_v21 = vrot.slane %v230_v19, 1  ;;  %v238_v22 = vadd.f32 %v237_v20, %v236_v17 }
  0x2f   : > { %v232_v24 = vadd.f32 %v231_v21, %v230_v19 }
  0x31   : > { %v249_v25 = vsel %vm248_vm0, %v238_v22, %v232_v24 }
  0x32   : > { %v251_v26 = vsel %vm250_vm1, %v244_v23, %v249_v25 }
  0x33   : > { %253 = vst [vmem:[%s189_s23] sm:$0x7] %v251_v26 }
  0x34 PF: > { %s12_s11 = sadd.s32 1, %s391_s11   ;;  %s451_s9 = smov %s387_s10 }
  0x35   : > { %p9_p5 = scmp.ge.s32.totalorder %s12_s11, 4   ;;  %s452_s10 = smov %s454_s12 }
  0x37   :  { %11 = sbr.rel (!%p9_p5) target bundleno = 2 (0x2), region = 71 }

</bundles_post_ra>
